<compile_context>
chip_gen: v7x
topology: tpu7x:2x2x1
jax: 0.10.0
libtpu: 0.0.40
codegen_flags: <defaults>
</compile_context>

<pallas_src>
import functools

import jax
import jax.numpy as jnp
from jax.experimental import pallas as pl
from jax.experimental.pallas import tpu as pltpu

LANES = 128
CHUNK_ROWS = 512           # inner-loop slice: 512*128*4 B = 256 KiB per temp
MAX_BLOCK_ROWS = 8192      # 8192*128*4 B = 4 MiB per f32 input block
CORE_SPLITS = 2            # leading "parallel" axis; up to 2 TCs on v7x
VMEM_LIMIT_BYTES = 48 << 20  # > 2 inputs * 2 buffers * 4 MiB + scratch; < v7x 64 MiB


def _round_up(x, m):
    return ((x + m - 1) // m) * m


def _dice_bce_kernel(p_ref, t_ref, out_ref, *, block_rows, chunk_rows,
                     blocks_per_core, total_blocks, n_valid):
    c = pl.program_id(0)   # core-split index ("parallel")
    i = pl.program_id(1)   # block index within this core's chunk ("arbitrary")
    blk = c * blocks_per_core + i

    @pl.when(i == 0)
    def _init():
        out_ref[...] = jnp.zeros_like(out_ref)

    num_chunks = block_rows // chunk_rows
    block_elems = block_rows * LANES
    # Valid elements remaining at the start of this block.  n_valid is a
    # trace-time Python int; requires n_valid < 2**31 (int32 index math).
    rem_in_block = n_valid - blk * block_elems
    in_range = blk < total_blocks          # skip clamped/duplicated blocks
    is_partial = rem_in_block < block_elems  # only the tail block needs a mask

    def accumulate(masked):
        zero = jnp.zeros((8, LANES), jnp.float32)

        def body(j, accs):
            acc_pt, acc_p, acc_t, acc_bce = accs
            r0 = pl.multiple_of(j * chunk_rows, chunk_rows)
            x = p_ref[pl.ds(r0, chunk_rows), :].astype(jnp.float32)  # logits
            t = t_ref[pl.ds(r0, chunk_rows), :].astype(jnp.float32)  # targets

            # Shared-exp sigmoid + logits-form BCE: 1 exp, 1 log, 1 approx
            # recip (+1 Newton) per element.
            # NOTE: PyTorch's binary_cross_entropy clamps log at -100; this
            # only differs for |logit| > ~100 (negligible for typical inputs).
            e = jnp.exp(-jnp.abs(x))
            denom = 1.0 + e                               # in [1, 2]
            r = pl.reciprocal(denom, approx=True)
            r = r * (2.0 - denom * r)                     # one Newton step
            p = jnp.where(x >= 0.0, 1.0, e) * r           # == sigmoid(x)
            bce = jnp.maximum(x, 0.0) - x * t + jnp.log(denom)

            if masked:
                # Only the partial tail block pays for mask construction.
                row_ids = jax.lax.broadcasted_iota(
                    jnp.int32, (chunk_rows, LANES), 0)
                lane_ids = jax.lax.broadcasted_iota(
                    jnp.int32, (chunk_rows, LANES), 1)
                base = (r0 + row_ids) * LANES + lane_ids
                valid = base < rem_in_block
                t = jnp.where(valid, t, 0.0)
                p = jnp.where(valid, p, 0.0)
                bce = jnp.where(valid, bce, 0.0)

            def fold(v):
                # (chunk_rows, LANES) -> (8, LANES): pure vreg-wise VPU adds.
                return jnp.sum(v.reshape(chunk_rows // 8, 8, LANES), axis=0)

            return (acc_pt + fold(p * t), acc_p + fold(p),
                    acc_t + fold(t), acc_bce + fold(bce))

        accs = jax.lax.fori_loop(
            0, num_chunks, body, (zero, zero, zero, zero),
            unroll=min(4, num_chunks))

        out_ref[0, :, :] += accs[0]   # intersection partials
        out_ref[1, :, :] += accs[1]   # sum(sigmoid(x)) partials
        out_ref[2, :, :] += accs[2]   # sum(t) partials
        out_ref[3, :, :] += accs[3]   # sum(bce) partials

    @pl.when(jnp.logical_and(in_range, jnp.logical_not(is_partial)))
    def _full_block():
        accumulate(masked=False)

    @pl.when(jnp.logical_and(in_range, is_partial))
    def _partial_block():
        accumulate(masked=True)


def _partial_sums(p_flat, t_flat):
    n = p_flat.shape[0]

    rem = (-n) % LANES
    if rem:
        # TODO(synk): rare ragged n % 128 case costs one extra HBM pad pass of
        # both tensors; the padded elements are masked out in-kernel anyway.
        p_flat = jnp.pad(p_flat, (0, rem))
        t_flat = jnp.pad(t_flat, (0, rem))
    rows = (n + rem) // LANES

    p2 = p_flat.reshape(rows, LANES)
    t2 = t_flat.reshape(rows, LANES)

    if rows <= CHUNK_ROWS:
        block_rows = _round_up(rows, 8)   # single small block / single chunk
        chunk_rows = block_rows
    else:
        block_rows = min(MAX_BLOCK_ROWS, _round_up(rows, CHUNK_ROWS))
        chunk_rows = CHUNK_ROWS

    total_blocks = pl.cdiv(rows, block_rows)
    blocks_per_core = pl.cdiv(total_blocks, CORE_SPLITS)

    kernel = functools.partial(
        _dice_bce_kernel,
        block_rows=block_rows,
        chunk_rows=chunk_rows,
        blocks_per_core=blocks_per_core,
        total_blocks=total_blocks,
        n_valid=n,
    )

    # Clamp the block index so the DMA window always refers to a real block;
    # the kernel skips compute for clamped duplicates (blk >= total_blocks).
    def in_map(c, i):
        return (jnp.minimum(c * blocks_per_core + i, total_blocks - 1), 0)

    out = pl.pallas_call(
        kernel,
        out_shape=jax.ShapeDtypeStruct((CORE_SPLITS, 4, 8, LANES), jnp.float32),
        grid_spec=pltpu.PrefetchScalarGridSpec(
            num_scalar_prefetch=0,
            grid=(CORE_SPLITS, blocks_per_core),
            in_specs=[
                pl.BlockSpec((block_rows, LANES), in_map),
                pl.BlockSpec((block_rows, LANES), in_map),
            ],
            out_specs=pl.BlockSpec((None, 4, 8, LANES),
                                   lambda c, i: (c, 0, 0, 0)),
        ),
        compiler_params=pltpu.CompilerParams(
            dimension_semantics=("parallel", "arbitrary"),
            vmem_limit_bytes=VMEM_LIMIT_BYTES,
        ),
    )(p2, t2)
    return out


@functools.partial(jax.jit, static_argnames=("bce_weight", "smooth"))
def dice_bce_loss(preds, targets, bce_weight=0.5, smooth=1.0):
    """Matches DiceBCELoss.forward(preds, targets)."""
    p_flat = preds.reshape(-1)     # native dtype; f32 cast happens per-chunk in-kernel
    t_flat = targets.reshape(-1)
    n = p_flat.shape[0]

    partials = _partial_sums(p_flat, t_flat)      # (CORE_SPLITS, 4, 8, 128)
    s = jnp.sum(partials, axis=(0, 2, 3))         # tiny final cross-lane reduce
    intersection, sum_p, sum_t, sum_bce = s[0], s[1], s[2], s[3]

    dice_loss = 1.0 - (2.0 * intersection + smooth) / (sum_p + sum_t + smooth)
    bce = sum_bce / n
    return bce * bce_weight + (1.0 - bce_weight) * dice_loss


def _reference(preds, targets, bce_weight=0.5, smooth=1.0):
    p = jax.nn.sigmoid(preds.reshape(-1).astype(jnp.float32))
    t = targets.reshape(-1).astype(jnp.float32)
    inter = jnp.sum(p * t)
    dice = 1.0 - (2.0 * inter + smooth) / (jnp.sum(p) + jnp.sum(t) + smooth)
    bce = jnp.mean(-(t * jnp.log(p) + (1.0 - t) * jnp.log(1.0 - p)))
    return bce * bce_weight + (1.0 - bce_weight) * dice


if __name__ == "__main__":
    key = jax.random.PRNGKey(0)
    k1, k2 = jax.random.split(key)

    # (batch=2, channels=4, H=16, W=16), NCHW like the PyTorch module.
    preds = jax.random.normal(k1, (2, 4, 16, 16), dtype=jnp.float32)
    targets = jax.random.bernoulli(k2, p=0.5, shape=(2, 4, 16, 16)).astype(
        jnp.float32
    )

    loss = dice_bce_loss(preds, targets)
    loss = jax.block_until_ready(loss)

    ref = _reference(preds, targets)
    assert jnp.allclose(loss, ref, atol=1e-5, rtol=1e-5), (loss, ref)

    print("KERNEL_OK")
</pallas_src>

<mosaic_0001>
module attributes {stable_mosaic.version = 11 : i64} {
  func.func @_dice_bce_kernel(%arg0: i32, %arg1: i32, %arg2: memref<16x128xf32, #tpu.memory_space<vmem>>, %arg3: memref<16x128xf32, #tpu.memory_space<vmem>>, %arg4: memref<1x4x8x128xf32, #tpu.memory_space<vmem>>) attributes {dimension_semantics = [#tpu.dimension_semantics<parallel>, #tpu.dimension_semantics<arbitrary>], iteration_bounds = array<i64: 2, 1>, scalar_prefetch = 0 : i64, scratch_operands = 0 : i64, tpu.core_type = #tpu.core_type<tc>, window_params = [{transform_indices = @transform_0, window_bounds = array<i64: 16, 128>}, {transform_indices = @transform_1, window_bounds = array<i64: 16, 128>}, {transform_indices = @transform_2, window_bounds = array<i64: 1, 4, 8, 128>}]} {
    %c1_i32 = arith.constant 1 : i32
    %0 = arith.muli %arg0, %c1_i32 : i32
    %1 = arith.addi %0, %arg1 : i32
    %c0_i32 = arith.constant 0 : i32
    %2 = arith.cmpi eq, %arg1, %c0_i32 : i32
    %3 = arith.extui %2 : i1 to i32
    %c0_i32_0 = arith.constant 0 : i32
    %4 = arith.cmpi ne, %3, %c0_i32_0 : i32
    scf.if %4 {
      %cst = arith.constant 0.000000e+00 : f32
      %16 = vector.broadcast %cst : f32 to vector<4x8x128xf32>
      %c0 = arith.constant 0 : index
      %c0_6 = arith.constant 0 : index
      %c0_7 = arith.constant 0 : index
      %c0_8 = arith.constant 0 : index
      %17 = vector.load %arg4[%c0, %c0_6, %c0_7, %c0_8] : memref<1x4x8x128xf32, #tpu.memory_space<vmem>>, vector<1x4x8x128xf32>
      %18 = vector.shape_cast %17 : vector<1x4x8x128xf32> to vector<4x8x128xf32>
      %19 = vector.shape_cast %16 : vector<4x8x128xf32> to vector<1x4x8x128xf32>
      tpu.vector_store %arg4[%c0, %c0_6, %c0_7, %c0_8], %19 {strides = array<i32>} : memref<1x4x8x128xf32, #tpu.memory_space<vmem>>, vector<1x4x8x128xf32>,
    } else {
    }
    %c2048_i32 = arith.constant 2048 : i32
    %5 = arith.muli %1, %c2048_i32 : i32
    %c2048_i32_1 = arith.constant 2048 : i32
    %6 = arith.subi %c2048_i32_1, %5 : i32
    %c1_i32_2 = arith.constant 1 : i32
    %7 = arith.cmpi slt, %1, %c1_i32_2 : i32
    %c2048_i32_3 = arith.constant 2048 : i32
    %8 = arith.cmpi slt, %6, %c2048_i32_3 : i32
    %true = arith.constant true
    %9 = arith.xori %8, %true : i1
    %10 = arith.andi %7, %9 : i1
    %11 = arith.extui %10 : i1 to i32
    %c0_i32_4 = arith.constant 0 : i32
    %12 = arith.cmpi ne, %11, %c0_i32_4 : i32
    scf.if %12 {
      %cst = arith.constant 0.000000e+00 : f32
      %16 = vector.broadcast %cst : f32 to vector<8x128xf32>
      %c0_i32_6 = arith.constant 0 : i32
      %c16_i32 = arith.constant 16 : i32
      %17 = arith.muli %c0_i32_6, %c16_i32 : i32
      %18 = tpu.assume_multiple %17, 16 : i32
      %19 = arith.index_cast %18 : i32 to index
      %c0 = arith.constant 0 : index
      %20 = vector.load %arg2[%19, %c0] : memref<16x128xf32, #tpu.memory_space<vmem>>, vector<16x128xf32>
      %21 = arith.index_cast %18 : i32 to index
      %c0_7 = arith.constant 0 : index
      %22 = vector.load %arg3[%21, %c0_7] : memref<16x128xf32, #tpu.memory_space<vmem>>, vector<16x128xf32>
      %23 = math.absf %20 : vector<16x128xf32>
      %cst_8 = arith.constant 0.000000e+00 : f32
      %24 = vector.broadcast %cst_8 : f32 to vector<16x128xf32>
      %25 = arith.subf %24, %23 : vector<16x128xf32>
      %26 = math.exp %25 : vector<16x128xf32>
      %cst_9 = arith.constant 1.000000e+00 : f32
      %27 = vector.broadcast %cst_9 : f32 to vector<16x128xf32>
      %28 = arith.addf %27, %26 : vector<16x128xf32>
      %29 = tpu.reciprocal %28 {approx = true} : vector<16x128xf32> -> vector<16x128xf32>
      %30 = arith.mulf %28, %29 : vector<16x128xf32>
      %cst_10 = arith.constant 2.000000e+00 : f32
      %31 = vector.broadcast %cst_10 : f32 to vector<16x128xf32>
      %32 = arith.subf %31, %30 : vector<16x128xf32>
      %33 = arith.mulf %29, %32 : vector<16x128xf32>
      %cst_11 = arith.constant 0.000000e+00 : f32
      %34 = vector.broadcast %cst_11 : f32 to vector<16x128xf32>
      %35 = arith.cmpf oge, %20, %34 : vector<16x128xf32>
      %cst_12 = arith.constant 1.000000e+00 : f32
      %36 = vector.broadcast %cst_12 : f32 to vector<16x128xf32>
      %37 = arith.select %35, %36, %26 : vector<16x128xi1>, vector<16x128xf32>
      %38 = arith.mulf %37, %33 : vector<16x128xf32>
      %cst_13 = arith.constant 0.000000e+00 : f32
      %39 = vector.broadcast %cst_13 : f32 to vector<16x128xf32>
      %40 = arith.maximumf %20, %39 : vector<16x128xf32>
      %41 = arith.mulf %20, %22 : vector<16x128xf32>
      %42 = arith.subf %40, %41 : vector<16x128xf32>
      %43 = math.log %28 : vector<16x128xf32>
      %44 = arith.addf %42, %43 : vector<16x128xf32>
      %45 = arith.mulf %38, %22 : vector<16x128xf32>
      %46 = vector.shape_cast %45 : vector<16x128xf32> to vector<2x8x128xf32>
      %cst_14 = arith.constant dense<0.000000e+00> : vector<8x128xf32>
      %47 = vector.multi_reduction <add>, %46, %cst_14 [0] : vector<2x8x128xf32> to vector<8x128xf32>
      %48 = arith.addf %16, %47 : vector<8x128xf32>
      %49 = vector.shape_cast %38 : vector<16x128xf32> to vector<2x8x128xf32>
      %cst_15 = arith.constant dense<0.000000e+00> : vector<8x128xf32>
      %50 = vector.multi_reduction <add>, %49, %cst_15 [0] : vector<2x8x128xf32> to vector<8x128xf32>
      %51 = arith.addf %16, %50 : vector<8x128xf32>
      %52 = vector.shape_cast %22 : vector<16x128xf32> to vector<2x8x128xf32>
      %cst_16 = arith.constant dense<0.000000e+00> : vector<8x128xf32>
      %53 = vector.multi_reduction <add>, %52, %cst_16 [0] : vector<2x8x128xf32> to vector<8x128xf32>
      %54 = arith.addf %16, %53 : vector<8x128xf32>
      %55 = vector.shape_cast %44 : vector<16x128xf32> to vector<2x8x128xf32>
      %cst_17 = arith.constant dense<0.000000e+00> : vector<8x128xf32>
      %56 = vector.multi_reduction <add>, %55, %cst_17 [0] : vector<2x8x128xf32> to vector<8x128xf32>
      %57 = arith.addf %16, %56 : vector<8x128xf32>
      %c1_i32_18 = arith.constant 1 : i32
      %c0_19 = arith.constant 0 : index
      %c0_20 = arith.constant 0 : index
      %c0_21 = arith.constant 0 : index
      %c0_22 = arith.constant 0 : index
      %58 = vector.load %arg4[%c0_19, %c0_20, %c0_21, %c0_22] : memref<1x4x8x128xf32, #tpu.memory_space<vmem>>, vector<1x1x8x128xf32>
      %59 = vector.shape_cast %58 : vector<1x1x8x128xf32> to vector<8x128xf32>
      %60 = arith.addf %59, %48 : vector<8x128xf32>
      %c0_23 = arith.constant 0 : index
      %c0_24 = arith.constant 0 : index
      %c0_25 = arith.constant 0 : index
      %c0_26 = arith.constant 0 : index
      %61 = vector.load %arg4[%c0_23, %c0_24, %c0_25, %c0_26] : memref<1x4x8x128xf32, #tpu.memory_space<vmem>>, vector<1x1x8x128xf32>
      %62 = vector.shape_cast %61 : vector<1x1x8x128xf32> to vector<8x128xf32>
      %63 = vector.shape_cast %60 : vector<8x128xf32> to vector<1x1x8x128xf32>
      tpu.vector_store %arg4[%c0_23, %c0_24, %c0_25, %c0_26], %63 {strides = array<i32>} : memref<1x4x8x128xf32, #tpu.memory_space<vmem>>, vector<1x1x8x128xf32>,
      %c0_27 = arith.constant 0 : index
      %c1 = arith.constant 1 : index
      %c0_28 = arith.constant 0 : index
      %c0_29 = arith.constant 0 : index
      %64 = vector.load %arg4[%c0_27, %c1, %c0_28, %c0_29] : memref<1x4x8x128xf32, #tpu.memory_space<vmem>>, vector<1x1x8x128xf32>
      %65 = vector.shape_cast %64 : vector<1x1x8x128xf32> to vector<8x128xf32>
      %66 = arith.addf %65, %51 : vector<8x128xf32>
      %c0_30 = arith.constant 0 : index
      %c1_31 = arith.constant 1 : index
      %c0_32 = arith.constant 0 : index
      %c0_33 = arith.constant 0 : index
      %67 = vector.load %arg4[%c0_30, %c1_31, %c0_32, %c0_33] : memref<1x4x8x128xf32, #tpu.memory_space<vmem>>, vector<1x1x8x128xf32>
      %68 = vector.shape_cast %67 : vector<1x1x8x128xf32> to vector<8x128xf32>
      %69 = vector.shape_cast %66 : vector<8x128xf32> to vector<1x1x8x128xf32>
      tpu.vector_store %arg4[%c0_30, %c1_31, %c0_32, %c0_33], %69 {strides = array<i32>} : memref<1x4x8x128xf32, #tpu.memory_space<vmem>>, vector<1x1x8x128xf32>,
      %c0_34 = arith.constant 0 : index
      %c2 = arith.constant 2 : index
      %c0_35 = arith.constant 0 : index
      %c0_36 = arith.constant 0 : index
      %70 = vector.load %arg4[%c0_34, %c2, %c0_35, %c0_36] : memref<1x4x8x128xf32, #tpu.memory_space<vmem>>, vector<1x1x8x128xf32>
      %71 = vector.shape_cast %70 : vector<1x1x8x128xf32> to vector<8x128xf32>
      %72 = arith.addf %71, %54 : vector<8x128xf32>
      %c0_37 = arith.constant 0 : index
      %c2_38 = arith.constant 2 : index
      %c0_39 = arith.constant 0 : index
      %c0_40 = arith.constant 0 : index
      %73 = vector.load %arg4[%c0_37, %c2_38, %c0_39, %c0_40] : memref<1x4x8x128xf32, #tpu.memory_space<vmem>>, vector<1x1x8x128xf32>
      %74 = vector.shape_cast %73 : vector<1x1x8x128xf32> to vector<8x128xf32>
      %75 = vector.shape_cast %72 : vector<8x128xf32> to vector<1x1x8x128xf32>
      tpu.vector_store %arg4[%c0_37, %c2_38, %c0_39, %c0_40], %75 {strides = array<i32>} : memref<1x4x8x128xf32, #tpu.memory_space<vmem>>, vector<1x1x8x128xf32>,
      %c0_41 = arith.constant 0 : index
      %c3 = arith.constant 3 : index
      %c0_42 = arith.constant 0 : index
      %c0_43 = arith.constant 0 : index
      %76 = vector.load %arg4[%c0_41, %c3, %c0_42, %c0_43] : memref<1x4x8x128xf32, #tpu.memory_space<vmem>>, vector<1x1x8x128xf32>
      %77 = vector.shape_cast %76 : vector<1x1x8x128xf32> to vector<8x128xf32>
      %78 = arith.addf %77, %57 : vector<8x128xf32>
      %c0_44 = arith.constant 0 : index
      %c3_45 = arith.constant 3 : index
      %c0_46 = arith.constant 0 : index
      %c0_47 = arith.constant 0 : index
      %79 = vector.load %arg4[%c0_44, %c3_45, %c0_46, %c0_47] : memref<1x4x8x128xf32, #tpu.memory_space<vmem>>, vector<1x1x8x128xf32>
      %80 = vector.shape_cast %79 : vector<1x1x8x128xf32> to vector<8x128xf32>
      %81 = vector.shape_cast %78 : vector<8x128xf32> to vector<1x1x8x128xf32>
      tpu.vector_store %arg4[%c0_44, %c3_45, %c0_46, %c0_47], %81 {strides = array<i32>} : memref<1x4x8x128xf32, #tpu.memory_space<vmem>>, vector<1x1x8x128xf32>,
    } else {
    }
    %13 = arith.andi %7, %8 : i1
    %14 = arith.extui %13 : i1 to i32
    %c0_i32_5 = arith.constant 0 : i32
    %15 = arith.cmpi ne, %14, %c0_i32_5 : i32
    scf.if %15 {
      %cst = arith.constant 0.000000e+00 : f32
      %16 = vector.broadcast %cst : f32 to vector<8x128xf32>
      %c0_i32_6 = arith.constant 0 : i32
      %c16_i32 = arith.constant 16 : i32
      %17 = arith.muli %c0_i32_6, %c16_i32 : i32
      %18 = tpu.assume_multiple %17, 16 : i32
      %19 = arith.index_cast %18 : i32 to index
      %c0 = arith.constant 0 : index
      %20 = vector.load %arg2[%19, %c0] : memref<16x128xf32, #tpu.memory_space<vmem>>, vector<16x128xf32>
      %21 = arith.index_cast %18 : i32 to index
      %c0_7 = arith.constant 0 : index
      %22 = vector.load %arg3[%21, %c0_7] : memref<16x128xf32, #tpu.memory_space<vmem>>, vector<16x128xf32>
      %23 = math.absf %20 : vector<16x128xf32>
      %cst_8 = arith.constant 0.000000e+00 : f32
      %24 = vector.broadcast %cst_8 : f32 to vector<16x128xf32>
      %25 = arith.subf %24, %23 : vector<16x128xf32>
      %26 = math.exp %25 : vector<16x128xf32>
      %cst_9 = arith.constant 1.000000e+00 : f32
      %27 = vector.broadcast %cst_9 : f32 to vector<16x128xf32>
      %28 = arith.addf %27, %26 : vector<16x128xf32>
      %29 = tpu.reciprocal %28 {approx = true} : vector<16x128xf32> -> vector<16x128xf32>
      %30 = arith.mulf %28, %29 : vector<16x128xf32>
      %cst_10 = arith.constant 2.000000e+00 : f32
      %31 = vector.broadcast %cst_10 : f32 to vector<16x128xf32>
      %32 = arith.subf %31, %30 : vector<16x128xf32>
      %33 = arith.mulf %29, %32 : vector<16x128xf32>
      %cst_11 = arith.constant 0.000000e+00 : f32
      %34 = vector.broadcast %cst_11 : f32 to vector<16x128xf32>
      %35 = arith.cmpf oge, %20, %34 : vector<16x128xf32>
      %cst_12 = arith.constant 1.000000e+00 : f32
      %36 = vector.broadcast %cst_12 : f32 to vector<16x128xf32>
      %37 = arith.select %35, %36, %26 : vector<16x128xi1>, vector<16x128xf32>
      %38 = arith.mulf %37, %33 : vector<16x128xf32>
      %cst_13 = arith.constant 0.000000e+00 : f32
      %39 = vector.broadcast %cst_13 : f32 to vector<16x128xf32>
      %40 = arith.maximumf %20, %39 : vector<16x128xf32>
      %41 = arith.mulf %20, %22 : vector<16x128xf32>
      %42 = arith.subf %40, %41 : vector<16x128xf32>
      %43 = math.log %28 : vector<16x128xf32>
      %44 = arith.addf %42, %43 : vector<16x128xf32>
      %45 = tpu.iota {dimensions = array<i32: 0>} : vector<16x128xi32>
      %46 = tpu.iota {dimensions = array<i32: 1>} : vector<16x128xi32>
      %47 = vector.broadcast %18 : i32 to vector<16x128xi32>
      %48 = arith.addi %47, %45 : vector<16x128xi32>
      %c128_i32 = arith.constant 128 : i32
      %49 = vector.broadcast %c128_i32 : i32 to vector<16x128xi32>
      %50 = arith.muli %48, %49 : vector<16x128xi32>
      %51 = arith.addi %50, %46 : vector<16x128xi32>
      %52 = vector.broadcast %6 : i32 to vector<16x128xi32>
      %53 = arith.cmpi slt, %51, %52 : vector<16x128xi32>
      %cst_14 = arith.constant 0.000000e+00 : f32
      %54 = vector.broadcast %cst_14 : f32 to vector<16x128xf32>
      %55 = arith.select %53, %22, %54 : vector<16x128xi1>, vector<16x128xf32>
      %cst_15 = arith.constant 0.000000e+00 : f32
      %56 = vector.broadcast %cst_15 : f32 to vector<16x128xf32>
      %57 = arith.select %53, %38, %56 : vector<16x128xi1>, vector<16x128xf32>
      %cst_16 = arith.constant 0.000000e+00 : f32
      %58 = vector.broadcast %cst_16 : f32 to vector<16x128xf32>
      %59 = arith.select %53, %44, %58 : vector<16x128xi1>, vector<16x128xf32>
      %60 = arith.mulf %57, %55 : vector<16x128xf32>
      %61 = vector.shape_cast %60 : vector<16x128xf32> to vector<2x8x128xf32>
      %cst_17 = arith.constant dense<0.000000e+00> : vector<8x128xf32>
      %62 = vector.multi_reduction <add>, %61, %cst_17 [0] : vector<2x8x128xf32> to vector<8x128xf32>
      %63 = arith.addf %16, %62 : vector<8x128xf32>
      %64 = vector.shape_cast %57 : vector<16x128xf32> to vector<2x8x128xf32>
      %cst_18 = arith.constant dense<0.000000e+00> : vector<8x128xf32>
      %65 = vector.multi_reduction <add>, %64, %cst_18 [0] : vector<2x8x128xf32> to vector<8x128xf32>
      %66 = arith.addf %16, %65 : vector<8x128xf32>
      %67 = vector.shape_cast %55 : vector<16x128xf32> to vector<2x8x128xf32>
      %cst_19 = arith.constant dense<0.000000e+00> : vector<8x128xf32>
      %68 = vector.multi_reduction <add>, %67, %cst_19 [0] : vector<2x8x128xf32> to vector<8x128xf32>
      %69 = arith.addf %16, %68 : vector<8x128xf32>
      %70 = vector.shape_cast %59 : vector<16x128xf32> to vector<2x8x128xf32>
      %cst_20 = arith.constant dense<0.000000e+00> : vector<8x128xf32>
      %71 = vector.multi_reduction <add>, %70, %cst_20 [0] : vector<2x8x128xf32> to vector<8x128xf32>
      %72 = arith.addf %16, %71 : vector<8x128xf32>
      %c1_i32_21 = arith.constant 1 : i32
      %c0_22 = arith.constant 0 : index
      %c0_23 = arith.constant 0 : index
      %c0_24 = arith.constant 0 : index
      %c0_25 = arith.constant 0 : index
      %73 = vector.load %arg4[%c0_22, %c0_23, %c0_24, %c0_25] : memref<1x4x8x128xf32, #tpu.memory_space<vmem>>, vector<1x1x8x128xf32>
      %74 = vector.shape_cast %73 : vector<1x1x8x128xf32> to vector<8x128xf32>
      %75 = arith.addf %74, %63 : vector<8x128xf32>
      %c0_26 = arith.constant 0 : index
      %c0_27 = arith.constant 0 : index
      %c0_28 = arith.constant 0 : index
      %c0_29 = arith.constant 0 : index
      %76 = vector.load %arg4[%c0_26, %c0_27, %c0_28, %c0_29] : memref<1x4x8x128xf32, #tpu.memory_space<vmem>>, vector<1x1x8x128xf32>
      %77 = vector.shape_cast %76 : vector<1x1x8x128xf32> to vector<8x128xf32>
      %78 = vector.shape_cast %75 : vector<8x128xf32> to vector<1x1x8x128xf32>
      tpu.vector_store %arg4[%c0_26, %c0_27, %c0_28, %c0_29], %78 {strides = array<i32>} : memref<1x4x8x128xf32, #tpu.memory_space<vmem>>, vector<1x1x8x128xf32>,
      %c0_30 = arith.constant 0 : index
      %c1 = arith.constant 1 : index
      %c0_31 = arith.constant 0 : index
      %c0_32 = arith.constant 0 : index
      %79 = vector.load %arg4[%c0_30, %c1, %c0_31, %c0_32] : memref<1x4x8x128xf32, #tpu.memory_space<vmem>>, vector<1x1x8x128xf32>
      %80 = vector.shape_cast %79 : vector<1x1x8x128xf32> to vector<8x128xf32>
      %81 = arith.addf %80, %66 : vector<8x128xf32>
      %c0_33 = arith.constant 0 : index
      %c1_34 = arith.constant 1 : index
      %c0_35 = arith.constant 0 : index
      %c0_36 = arith.constant 0 : index
      %82 = vector.load %arg4[%c0_33, %c1_34, %c0_35, %c0_36] : memref<1x4x8x128xf32, #tpu.memory_space<vmem>>, vector<1x1x8x128xf32>
      %83 = vector.shape_cast %82 : vector<1x1x8x128xf32> to vector<8x128xf32>
      %84 = vector.shape_cast %81 : vector<8x128xf32> to vector<1x1x8x128xf32>
      tpu.vector_store %arg4[%c0_33, %c1_34, %c0_35, %c0_36], %84 {strides = array<i32>} : memref<1x4x8x128xf32, #tpu.memory_space<vmem>>, vector<1x1x8x128xf32>,
      %c0_37 = arith.constant 0 : index
      %c2 = arith.constant 2 : index
      %c0_38 = arith.constant 0 : index
      %c0_39 = arith.constant 0 : index
      %85 = vector.load %arg4[%c0_37, %c2, %c0_38, %c0_39] : memref<1x4x8x128xf32, #tpu.memory_space<vmem>>, vector<1x1x8x128xf32>
      %86 = vector.shape_cast %85 : vector<1x1x8x128xf32> to vector<8x128xf32>
      %87 = arith.addf %86, %69 : vector<8x128xf32>
      %c0_40 = arith.constant 0 : index
      %c2_41 = arith.constant 2 : index
      %c0_42 = arith.constant 0 : index
      %c0_43 = arith.constant 0 : index
      %88 = vector.load %arg4[%c0_40, %c2_41, %c0_42, %c0_43] : memref<1x4x8x128xf32, #tpu.memory_space<vmem>>, vector<1x1x8x128xf32>
      %89 = vector.shape_cast %88 : vector<1x1x8x128xf32> to vector<8x128xf32>
      %90 = vector.shape_cast %87 : vector<8x128xf32> to vector<1x1x8x128xf32>
      tpu.vector_store %arg4[%c0_40, %c2_41, %c0_42, %c0_43], %90 {strides = array<i32>} : memref<1x4x8x128xf32, #tpu.memory_space<vmem>>, vector<1x1x8x128xf32>,
      %c0_44 = arith.constant 0 : index
      %c3 = arith.constant 3 : index
      %c0_45 = arith.constant 0 : index
      %c0_46 = arith.constant 0 : index
      %91 = vector.load %arg4[%c0_44, %c3, %c0_45, %c0_46] : memref<1x4x8x128xf32, #tpu.memory_space<vmem>>, vector<1x1x8x128xf32>
      %92 = vector.shape_cast %91 : vector<1x1x8x128xf32> to vector<8x128xf32>
      %93 = arith.addf %92, %72 : vector<8x128xf32>
      %c0_47 = arith.constant 0 : index
      %c3_48 = arith.constant 3 : index
      %c0_49 = arith.constant 0 : index
      %c0_50 = arith.constant 0 : index
      %94 = vector.load %arg4[%c0_47, %c3_48, %c0_49, %c0_50] : memref<1x4x8x128xf32, #tpu.memory_space<vmem>>, vector<1x1x8x128xf32>
      %95 = vector.shape_cast %94 : vector<1x1x8x128xf32> to vector<8x128xf32>
      %96 = vector.shape_cast %93 : vector<8x128xf32> to vector<1x1x8x128xf32>
      tpu.vector_store %arg4[%c0_47, %c3_48, %c0_49, %c0_50], %96 {strides = array<i32>} : memref<1x4x8x128xf32, #tpu.memory_space<vmem>>, vector<1x1x8x128xf32>,
    } else {
    }
    return
  }
  func.func @transform_0(%arg0: i32, %arg1: i32) -> (i32, i32) {
    %c1_i32 = arith.constant 1 : i32
    %0 = arith.muli %arg0, %c1_i32 : i32
    %1 = arith.addi %0, %arg1 : i32
    %c0_i32 = arith.constant 0 : i32
    %2 = arith.minsi %1, %c0_i32 : i32
    %c0_i32_0 = arith.constant 0 : i32
    %c0_i32_1 = arith.constant 0 : i32
    return %2, %c0_i32_0 : i32, i32
  }
  func.func @transform_1(%arg0: i32, %arg1: i32) -> (i32, i32) {
    %c1_i32 = arith.constant 1 : i32
    %0 = arith.muli %arg0, %c1_i32 : i32
    %1 = arith.addi %0, %arg1 : i32
    %c0_i32 = arith.constant 0 : i32
    %2 = arith.minsi %1, %c0_i32 : i32
    %c0_i32_0 = arith.constant 0 : i32
    %c0_i32_1 = arith.constant 0 : i32
    return %2, %c0_i32_0 : i32, i32
  }
  func.func @transform_2(%arg0: i32, %arg1: i32) -> (i32, i32, i32, i32) {
    %c0_i32 = arith.constant 0 : i32
    %c0_i32_0 = arith.constant 0 : i32
    %c0_i32_1 = arith.constant 0 : i32
    %c0_i32_2 = arith.constant 0 : i32
    return %arg0, %c0_i32, %c0_i32_0, %c0_i32_1 : i32, i32, i32, i32
  }
}

</mosaic_0001>

<bundles_post_ra>
// kernel: dice_bce_loss.1
= control target key start
LH: loop header
LB: loop body
LE: loop exit
PB: predicated region body
PF: predicated region fallthrough
CT: control target
= control target key end

     0   :  { %s586_s9 = smov 0   ;;  %s588_s10 = smov 0   ;;  %s696_s0 = inlined_call_operand.vmem [shape: f32[16,128], index: 0, kind: input, shape index: {}]   ;;  %s697_s1 = inlined_call_operand.vmem [shape: f32[16,128], index: 1, kind: input, shape index: {}]   ;;  %s698_s2 = inlined_call_operand.vmem [shape: f32[2,4,8,128], index: 2, kind: output, shape index: {}]  }
   0x1   :  { %s590_s11 = smov 0  }
   0x2 LB: > { %s24_s12 = sadd.s32 1, %s564_s10  ;;  %p474_p0 = scmp.ge.s32.totalorder %s568_s11, 1  ;;  %s568_s11 = sphi %s590_s11, %s12_s11   ;;  %s564_s10 = sphi %s588_s10, %s704_s10   ;;  %s560_s9 = sphi %s586_s9, %s703_s9  }
   0x3   : > { %p26_p1 = scmp.ge.s32.totalorder %s24_s12, 2  ;;  %p160_p2 = scmp.lt.s32.totalorder %s568_s11, 3 }
   0x5   : > { %s706_s12 = smov (%p26_p1, %s24_s12), 0  ;;  %p161_p3 = pnand %p474_p0, %p160_p2 }
   0x6   : > { %p194_p4 = scmp.lt.s32.totalorder (!%p161_p3), %s560_s9, 0  ;;  %p217_p5 = scmp.lt.s32.totalorder (!%p161_p3), %s560_s9, 1  ;;  %v570_v0 = vmov (!%p161_p3), 0.0  }
   0x7   : > { %164 = sbr.rel (%p161_p3) target bundleno = 118 (0x76), region = 28  ;;  %s481_s13 = sshll.u32 (!%p161_p3), %s560_s9, 11 }
   0x8   : > { %s613_s17 = ssub.s32 (!%p161_p3), 2048, %s481_s13 }
   0x9   : > { %p234_p7 = scmp.lt.s32.totalorder (!%p161_p3), %s613_s17, 2048  ;;  %p235_p8 = scmp.ge.s32.totalorder (!%p161_p3), %s613_s17, 2048 }
   0xb   : > { %p236_p9 = pnand (!%p161_p3), %p235_p8, %p217_p5 }
   0xe   : > { %s195_s14 = scalar_select %p194_p4, %s560_s9, 0 }
   0xf   : > { %s218_s15 = scalar_select %p217_p5, %s560_s9, 1 }
  0x10   : > { %s475_s16 = sshll.u32 %s195_s14, 1  ;;  %239 = sbr.rel (%p236_p9) target bundleno = 69 (0x45), region = 36 }
  0x11   : > { %p197_p6 = scmp.lt.s32.totalorder %s475_s16, 1  ;;  %s496_s18 = sshll.u32 %s218_s15, 5 }
  0x12   : > { %s618_s21 = scalar_lea.vmem %s698_s2, %s496_s18 }
  0x13   : > { %s708_s16 = smov (!%p197_p6, %s475_s16), 1  ;;  %227 = vst [vmem:[%s618_s21] sm:$0xff] %v570_v0  ;;  %228 = vst [vmem:[%s618_s21 + $0x8] sm:$0xff] %v570_v0 }
  0x14   : > { %229 = vst [vmem:[%s618_s21 + $0x10] sm:$0xff] %v570_v0  ;;  %230 = vst [vmem:[%s618_s21 + $0x18] sm:$0xff] %v570_v0  ;;  %s476_s22 = sshll.u32 %s708_s16, 3 }
  0x15   : > { %s629_s25 = scalar_lea.vmem %s696_s0, %s476_s22  ;;  %s634_s28 = scalar_lea.vmem %s697_s1, %s476_s22 }
  0x16   : > { %v240_v1 = vld [vmem:[%s629_s25] sm:$0xff] (!%p236_p9)  ;;  %v241_v2 = vld [vmem:[%s629_s25 + $0x8] sm:$0xff] (!%p236_p9) }
  0x17   : > { %v242_v3 = vld [vmem:[%s634_s28] sm:$0xff]  ;;  %v243_v4 = vld [vmem:[%s634_s28 + $0x8] sm:$0xff]  ;;  %v244_v5 = vand.u32 2147483647, %v240_v1  ;;  %v245_v6 = vand.u32 2147483647, %v241_v2 }
  0x18   : > { %v286_v7 = vadd.f32 %v243_v4, %v242_v3  ;;  %v268_v18 = vmax.f32 %v240_v1, 0.0  ;;  %v270_v19 = vmul.f32 %v242_v3, %v240_v1  ;;  %v269_v20 = vmax.f32 %v241_v2, 0.0 }
  0x19   : > { %v246_v9 = vsub.f32 0.0, %v244_v5  ;;  %v247_v10 = vsub.f32 0.0, %v245_v6  ;;  %v271_v21 = vmul.f32 %v243_v4, %v241_v2  ;;  %vm262_vm0 = vcmp.ge.f32.partialorder %v240_v1, 0.0 }
  0x1a   : > { %v272_v25 = vsub.f32 %v268_v18, %v270_v19  ;;  %vm263_vm1 = vcmp.ge.f32.partialorder %v241_v2, 0.0  ;;  %v482_v45 = vld [vmem:[%s618_s21 + $0x8] sm:$0xff]  ;;  %v290_v49 = vld [vmem:[%s618_s21] sm:$0xff] }
  0x1b   : > { %v484_v8 = vld [vmem:[%s618_s21 + $0x10] sm:$0xff]  ;;  %v248_v12 = vmul.f32 1.442695, %v246_v9  ;;  %v250_v13 = vmul.f32 1.442695, %v247_v10  ;;  %v273_v28 = vsub.f32 %v269_v20, %v271_v21  ;;  %v486_v41 = vld [vmem:[%s618_s21 + $0x18] sm:$0xff] }
  0x1c   : > { %v299_v11 = vadd.f32 %v484_v8, %v286_v7 }
  0x1d   : > { %522 = vpow2.f32 %v248_v12 }
  0x1e   : > { %485 = vst [vmem:[%s618_s21 + $0x10] sm:$0xff] %v299_v11  ;;  %524 = vpow2.f32 %v250_v13 }
  0x27   : > { %v523_v14 = vpop.eup %522 }
  0x28   : > { %v525_v15 = vpop.eup %524  ;;  %v252_v16 = vadd.f32 1.0, %v523_v14  ;;  %v264_v33 = vsel %vm262_vm0, 1.0, %v523_v14 }
  0x29   : > { %v253_v17 = vadd.f32 1.0, %v525_v15  ;;  %v265_v36 = vsel %vm263_vm1, 1.0, %v525_v15 }
  0x2a   : > { %526 = vrcp.f32 %v252_v16 }
  0x2b   : > { %528 = vrcp.f32 %v253_v17 }
  0x2c   : > { %530 = vlog2.f32 %v252_v16 }
  0x2d   : > { %532 = vlog2.f32 %v253_v17 }
  0x34   : > { %v527_v22 = vpop.eup %526 }
  0x35   : > { %v529_v23 = vpop.eup %528  ;;  %v256_v24 = vmul.f32 %v527_v22, %v252_v16 }
  0x36   : > { %v531_v26 = vpop.eup %530  ;;  %v257_v27 = vmul.f32 %v529_v23, %v253_v17 }
  0x37   : > { %v533_v29 = vpop.eup %532  ;;  %v258_v30 = vsub.f32 2.0, %v256_v24  ;;  %v275_v31 = vmul.f32 0.6931472, %v531_v26 }
  0x38   : > { %v259_v32 = vsub.f32 2.0, %v257_v27  ;;  %v277_v34 = vmul.f32 0.6931472, %v533_v29 }
  0x39   : > { %v260_v35 = vmul.f32 %v527_v22, %v258_v30  ;;  %v278_v37 = vadd.f32 %v275_v31, %v272_v25 }
  0x3a   : > { %v261_v38 = vmul.f32 %v529_v23, %v259_v32  ;;  %v279_v39 = vadd.f32 %v277_v34, %v273_v28 }
  0x3b   : > { %v266_v40 = vmul.f32 %v264_v33, %v260_v35 }
  0x3c   : > { %v267_v42 = vmul.f32 %v265_v36, %v261_v38  ;;  %v288_v43 = vadd.f32 %v279_v39, %v278_v37 }
  0x3d   : > { %v280_v44 = vmul.f32 %v266_v40, %v242_v3 }
  0x3e   : > { %v281_v46 = vmul.f32 %v267_v42, %v243_v4  ;;  %v284_v47 = vadd.f32 %v267_v42, %v266_v40  ;;  %v303_v48 = vadd.f32 %v486_v41, %v288_v43 }
  0x40   : > { %v282_v50 = vadd.f32 %v281_v46, %v280_v44  ;;  %v295_v51 = vadd.f32 %v482_v45, %v284_v47  ;;  %487 = vst [vmem:[%s618_s21 + $0x18] sm:$0xff] %v303_v48 }
  0x42   : > { %v291_v52 = vadd.f32 %v290_v49, %v282_v50  ;;  %483 = vst [vmem:[%s618_s21 + $0x8] sm:$0xff] %v295_v51 }
  0x44   : > { %292 = vst [vmem:[%s618_s21] sm:$0xff] %v291_v52 }
  0x45 PF: > { %p305_p10 = pnand %p234_p7, %p217_p5 }
  0x46   : > { %v309_v53 = vld [vmem:[%s629_s25] sm:$0xff] (!%p305_p10)  ;;  %v310_v54 = vld [vmem:[%s629_s25 + $0x8] sm:$0xff] (!%p305_p10)  ;;  %v349_v55 = vlaneseq (!%p305_p10)  ;;  %v361_v2 = vstv (!%p305_p10), %s613_s17 }
  0x47   : > { %308 = sbr.rel (%p305_p10) target bundleno = 118 (0x76), region = 40  ;;  %v313_v56 = vand.u32 (!%p305_p10), 2147483647, %v309_v53  ;;  %v314_v57 = vand.u32 (!%p305_p10), 2147483647, %v310_v54  ;;  %v311_v7 = vld [vmem:[%s634_s28] sm:$0xff] (!%p305_p10) }
  0x48   : > { %v350_v58 = vshrl.u32 (!%p305_p10), %v349_v55, 7  ;;  %v353_v59 = vand.u32 (!%p305_p10), 127, %v349_v55  ;;  %v312_v8 = vld [vmem:[%s634_s28 + $0x8] sm:$0xff] (!%p305_p10)  ;;  %v339_v19 = vmul.f32 (!%p305_p10), %v311_v7, %v309_v53  ;;  %v337_v20 = vmax.f32 (!%p305_p10), %v309_v53, 0.0 }
  0x49   : > { %v315_v60 = vsub.f32 (!%p305_p10), 0.0, %v313_v56  ;;  %v316_v61 = vsub.f32 (!%p305_p10), 0.0, %v314_v57  ;;  %v490_v12 = vld [vmem:[%s618_s21 + $0x10] sm:$0xff] (!%p305_p10)  ;;  %v340_v21 = vmul.f32 (!%p305_p10), %v312_v8, %v310_v54  ;;  %v338_v22 = vmax.f32 (!%p305_p10), %v310_v54, 0.0  ;;  %v492_v45 = vld [vmem:[%s618_s21 + $0x18] sm:$0xff] (!%p305_p10)  ;;  %v488_v50 = vld [vmem:[%s618_s21 + $0x8] sm:$0xff] (!%p305_p10) }
  0x4a   : > { %v351_v62 = vadd.s32 (!%p305_p10), 8, %v350_v58  ;;  %v357_v63 = vmul.u32 (!%p305_p10), 128, %v350_v58  ;;  %vm331_vm4 = vcmp.ge.f32.partialorder (!%p305_p10), %v309_v53, 0.0  ;;  %v341_v26 = vsub.f32 (!%p305_p10), %v337_v20, %v339_v19 }
  0x4b   : > { %v317_v0 = vmul.f32 (!%p305_p10), 1.442695, %v315_v60  ;;  %v319_v1 = vmul.f32 (!%p305_p10), 1.442695, %v316_v61  ;;  %vm332_vm5 = vcmp.ge.f32.partialorder (!%p305_p10), %v310_v54, 0.0  ;;  %v342_v29 = vsub.f32 (!%p305_p10), %v338_v22, %v340_v21  ;;  %v380_v54 = vld [vmem:[%s618_s21] sm:$0xff] (!%p305_p10) }
  0x4c   : > { %v358_v3 = vmul.u32 (!%p305_p10), 128, %v351_v62  ;;  %v359_v4 = vadd.s32 (!%p305_p10), %v357_v63, %v353_v59 }
  0x4d   : > { %534 = vpow2.f32 (!%p305_p10), %v317_v0 }
  0x4e   : > { %536 = vpow2.f32 %v319_v1  ;;  %v360_v5 = vadd.s32 %v358_v3, %v353_v59  ;;  %vm657_vm2 = vcmp.lt.s32.totalorder %v359_v4, %v361_v2 }
  0x4f   : > { %v364_v10 = vsel %vm657_vm2, %v311_v7, 0.0 }
  0x50   : > { %vm663_vm3 = vcmp.lt.s32.totalorder %v360_v5, %v361_v2 }
  0x51   : > { %v365_v11 = vsel %vm663_vm3, %v312_v8, 0.0 }
  0x52   : > { %v376_v13 = vadd.f32 %v365_v11, %v364_v10 }
  0x54   : > { %v389_v14 = vadd.f32 %v490_v12, %v376_v13 }
  0x56   : > { %491 = vst [vmem:[%s618_s21 + $0x10] sm:$0xff] %v389_v14 }
  0x57   : > { %v535_v15 = vpop.eup %534 }
  0x58   : > { %v537_v16 = vpop.eup %536  ;;  %v321_v17 = vadd.f32 1.0, %v535_v15  ;;  %v333_v34 = vsel %vm331_vm4, 1.0, %v535_v15 }
  0x59   : > { %v322_v18 = vadd.f32 1.0, %v537_v16  ;;  %v334_v37 = vsel %vm332_vm5, 1.0, %v537_v16 }
  0x5a   : > { %538 = vrcp.f32 %v321_v17 }
  0x5b   : > { %540 = vrcp.f32 %v322_v18 }
  0x5c   : > { %542 = vlog2.f32 %v321_v17 }
  0x5d   : > { %544 = vlog2.f32 %v322_v18 }
  0x64   : > { %v539_v23 = vpop.eup %538 }
  0x65   : > { %v541_v24 = vpop.eup %540  ;;  %v325_v25 = vmul.f32 %v539_v23, %v321_v17 }
  0x66   : > { %v543_v27 = vpop.eup %542  ;;  %v326_v28 = vmul.f32 %v541_v24, %v322_v18 }
  0x67   : > { %v545_v30 = vpop.eup %544  ;;  %v327_v31 = vsub.f32 2.0, %v325_v25  ;;  %v344_v32 = vmul.f32 0.6931472, %v543_v27 }
  0x68   : > { %v328_v33 = vsub.f32 2.0, %v326_v28  ;;  %v346_v35 = vmul.f32 0.6931472, %v545_v30 }
  0x69   : > { %v329_v36 = vmul.f32 %v539_v23, %v327_v31  ;;  %v347_v38 = vadd.f32 %v344_v32, %v341_v26 }
  0x6a   : > { %v330_v39 = vmul.f32 %v541_v24, %v328_v33  ;;  %v348_v40 = vadd.f32 %v346_v35, %v342_v29 }
  0x6b   : > { %v335_v41 = vmul.f32 %v333_v34, %v329_v36  ;;  %v368_v42 = vsel %vm657_vm2, %v347_v38, 0.0 }
  0x6c   : > { %v336_v43 = vmul.f32 %v334_v37, %v330_v39  ;;  %v369_v44 = vsel %vm663_vm3, %v348_v40, 0.0 }
  0x6d   : > { %v366_v46 = vsel %vm657_vm2, %v335_v41, 0.0  ;;  %v378_v47 = vadd.f32 %v369_v44, %v368_v42 }
  0x6e   : > { %v367_v48 = vsel %vm663_vm3, %v336_v43, 0.0  ;;  %v370_v49 = vmul.f32 %v366_v46, %v364_v10 }
  0x6f   : > { %v371_v51 = vmul.f32 %v367_v48, %v365_v11  ;;  %v374_v52 = vadd.f32 %v367_v48, %v366_v46  ;;  %v393_v53 = vadd.f32 %v492_v45, %v378_v47 }
  0x71   : > { %v372_v55 = vadd.f32 %v371_v51, %v370_v49  ;;  %v385_v56 = vadd.f32 %v488_v50, %v374_v52  ;;  %493 = vst [vmem:[%s618_s21 + $0x18] sm:$0xff] %v393_v53 }
  0x73   : > { %v381_v57 = vadd.f32 %v380_v54, %v372_v55  ;;  %489 = vst [vmem:[%s618_s21 + $0x8] sm:$0xff] %v385_v56 }
  0x75   : > { %382 = vst [vmem:[%s618_s21] sm:$0xff] %v381_v57 }
  0x76 PF: > { %s12_s11 = sadd.s32 1, %s568_s11   ;;  %s703_s9 = smov %s564_s10 }
  0x77   : > { %p9_p11 = scmp.ge.s32.totalorder %s12_s11, 4   ;;  %s704_s10 = smov %s706_s12 }
  0x79   :  { %11 = sbr.rel (!%p9_p11) target bundleno = 2 (0x2), region = 79 }

</bundles_post_ra>
